<compile_context>
chip_gen: v7x
topology: tpu7x:2x2x1
jax: 0.10.0
libtpu: 0.0.40
codegen_flags: <defaults>
</compile_context>

<pallas_src>
import jax
import jax.numpy as jnp
from jax.experimental import pallas as pl
from jax.experimental.pallas import tpu as pltpu


# Lane-dense view width (multiple of 128) and rows per grid tile.
# 512 x 512 f32 = 1 MiB per block buffer -> (in + out) * 2 buffers = 4 MiB,
# comfortably inside the scoped-VMEM default on v5e / v6e / v7x.
_LANES = 512
_TILE_ROWS = 512


def _adjust_contrast_kernel(factor_ref, x_ref, o_ref):
    # factor_ref: (1,) f32 scalar in SMEM; x_ref/o_ref: (tile_rows, LANES) VMEM.
    f = factor_ref[0]
    x = x_ref[...].astype(jnp.float32)
    y = jnp.clip(x * f, 0.0, 1.0)
    o_ref[...] = y.astype(o_ref.dtype)


def adjust_contrast_pallas(x, factor):
    """x: any-shape float array (NCHW images). Returns clamp(x * factor, 0, 1)."""
    orig_shape = x.shape
    total = x.size

    # Flatten to a lane-dense (rows, _LANES) slab; pad the tail if needed.
    rows = -(-total // _LANES)
    pad = rows * _LANES - total
    flat = x.reshape(-1)
    if pad:
        flat = jnp.pad(flat, (0, pad))
    x2d = flat.reshape(rows, _LANES)

    # Row tile: full extent if small, otherwise a fixed 8-divisible tile so the
    # (8, 128) block constraint holds; Pallas masks the partial edge block.
    tile_rows = rows if rows <= _TILE_ROWS else _TILE_ROWS
    grid = (pl.cdiv(rows, tile_rows),)

    factor_arr = jnp.asarray(factor, dtype=jnp.float32).reshape(1)

    out2d = pl.pallas_call(
        _adjust_contrast_kernel,
        out_shape=jax.ShapeDtypeStruct(x2d.shape, x2d.dtype),
        grid=grid,
        in_specs=[
            # Contrast factor: whole (1,) array in SMEM every step (cheap).
            pl.BlockSpec(memory_space=pltpu.MemorySpace.SMEM),
            pl.BlockSpec((tile_rows, _LANES), lambda i: (i, 0)),
        ],
        out_specs=pl.BlockSpec((tile_rows, _LANES), lambda i: (i, 0)),
        compiler_params=pltpu.CompilerParams(
            dimension_semantics=("parallel",)),
    )(factor_arr, x2d)

    out_flat = out2d.reshape(-1)
    if pad:
        out_flat = out_flat[:total]
    return out_flat.reshape(orig_shape)


class AdjustContrastModule:
    """JAX equivalent of typical_noise_layers.Adjust_contrast.Adjust_contrast."""

    def __init__(self, factor):
        self.factor = factor

    def __call__(self, noised_and_cover):
        # clone() semantics: outputs are new arrays (JAX is functional anyway).
        encoded, cover = noised_and_cover[0], noised_and_cover[1]
        encoded = adjust_contrast_pallas(encoded, self.factor)
        return [encoded, cover]


if __name__ == "__main__":
    key = jax.random.PRNGKey(0)
    k1, k2, k3 = jax.random.split(key, 3)

    # Small NCHW shapes: batch=2, channels=4 (HiDDeN-style encoded images),
    # spatial=16. Values in [0, 1] like images.
    noised = jax.random.uniform(k1, (2, 4, 16, 16), dtype=jnp.float32)
    cover = jax.random.uniform(k2, (2, 3, 16, 16), dtype=jnp.float32)

    factor = 0.7
    layer = AdjustContrastModule(factor)
    out_noised, out_cover = layer([noised, cover])
    jax.block_until_ready(out_noised)
    jax.block_until_ready(out_cover)

    ref = jnp.clip(noised * factor, 0.0, 1.0)
    assert jnp.allclose(out_noised, ref, atol=1e-6), "mismatch vs reference"
    assert jnp.allclose(out_cover, cover), "cover tensor should be unchanged"

    # Second check: image-scale-ish tensor exercising multiple grid tiles and
    # the partial edge block (rows = 588 > TILE_ROWS = 512).
    big = jax.random.uniform(k3, (2, 3, 224, 224), dtype=jnp.float32) * 2.0
    out_big = adjust_contrast_pallas(big, factor)
    jax.block_until_ready(out_big)
    ref_big = jnp.clip(big * factor, 0.0, 1.0)
    assert jnp.allclose(out_big, ref_big, atol=1e-6), "mismatch on tiled path"

    print("KERNEL_OK")
</pallas_src>

<mosaic_0001>
module attributes {stable_mosaic.version = 11 : i64} {
  func.func @_adjust_contrast_kernel(%arg0: i32, %arg1: memref<1xf32, #tpu.memory_space<smem>>, %arg2: memref<4x512xf32, #tpu.memory_space<vmem>>, %arg3: memref<4x512xf32, #tpu.memory_space<vmem>>) attributes {dimension_semantics = [#tpu.dimension_semantics<parallel>], iteration_bounds = array<i64: 1>, scalar_prefetch = 0 : i64, scratch_operands = 0 : i64, tpu.core_type = #tpu.core_type<tc>, window_params = [{transform_indices = @transform_0, window_bounds = array<i64: 1>}, {transform_indices = @transform_1, window_bounds = array<i64: 4, 512>}, {transform_indices = @transform_2, window_bounds = array<i64: 4, 512>}]} {
    %c0 = arith.constant 0 : index
    %0 = memref.load %arg1[%c0] : memref<1xf32, #tpu.memory_space<smem>>
    %c0_0 = arith.constant 0 : index
    %c0_1 = arith.constant 0 : index
    %1 = vector.load %arg2[%c0_0, %c0_1] : memref<4x512xf32, #tpu.memory_space<vmem>>, vector<4x512xf32>
    %2 = vector.broadcast %0 : f32 to vector<4x512xf32>
    %3 = arith.mulf %1, %2 : vector<4x512xf32>
    %cst = arith.constant 0.000000e+00 : f32
    %cst_2 = arith.constant 1.000000e+00 : f32
    %4 = vector.broadcast %cst : f32 to vector<4x512xf32>
    %5 = arith.maximumf %4, %3 : vector<4x512xf32>
    %6 = vector.broadcast %cst_2 : f32 to vector<4x512xf32>
    %7 = arith.minimumf %6, %5 : vector<4x512xf32>
    %c0_3 = arith.constant 0 : index
    %c0_4 = arith.constant 0 : index
    %8 = vector.load %arg3[%c0_3, %c0_4] : memref<4x512xf32, #tpu.memory_space<vmem>>, vector<4x512xf32>
    tpu.vector_store %arg3[%c0_3, %c0_4], %7 {strides = array<i32>} : memref<4x512xf32, #tpu.memory_space<vmem>>, vector<4x512xf32>,
    return
  }
  func.func @transform_0(%arg0: i32) -> i32 {
    %c0_i32 = arith.constant 0 : i32
    %c0_i32_0 = arith.constant 0 : i32
    return %c0_i32 : i32
  }
  func.func @transform_1(%arg0: i32) -> (i32, i32) {
    %c0_i32 = arith.constant 0 : i32
    %c0_i32_0 = arith.constant 0 : i32
    return %arg0, %c0_i32 : i32, i32
  }
  func.func @transform_2(%arg0: i32) -> (i32, i32) {
    %c0_i32 = arith.constant 0 : i32
    %c0_i32_0 = arith.constant 0 : i32
    return %arg0, %c0_i32 : i32, i32
  }
}

</mosaic_0001>

<bundles_post_ra>
// kernel: tpu_custom_call.1
= control target key start
LH: loop header
LB: loop body
LE: loop exit
PB: predicated region body
PF: predicated region fallthrough
CT: control target
= control target key end

     0   :  { %8 = vsyncpa [#allocation4], 0  ;;  %s146_s0 = inlined_call_operand.<no memory space> [shape: f32[1], index: 0, kind: input, shape index: {}]   ;;  %s147_s1 = inlined_call_operand.hbm [shape: f32[4,512], index: 1, kind: input, shape index: {}]   ;;  %s148_s2 = inlined_call_operand.hbm [shape: f32[4,512], index: 2, kind: output, shape index: {}]  }
   0x1   :  { %9 = vsyncpa [#allocation5], 0  ;;  %s102_s9 = smov [#allocation3]   ;;  %s54_s13 = scalar_lea.hbm %s147_s1, 256 }
   0x2   :  { %s18_s10 = sshll.u32 %s102_s9, 4  ;;  %p55_p0 = scmp.ne.s32.totalorder %s147_s1, %s54_s13  ;;  %s19_s10 = int_to_ptr.vmem [resolvable:$true] %s18_s10 }
   0x3   :  { %p58_p1 = scmp.lt.u32.totalorder %s54_s13, %s147_s1 }
   0x5   :  { %p60_p2 = pnand %p58_p1, %p55_p0 }
   0x7   :  { %63 = shalt.err (!%p60_p2)
}
   0x8   :  { %s64_s18 = scalar_lea.vmem %s19_s10, 256  ;;  %p69_p4 = scmp.lt.s32.totalorder %s19_s10, %s19_s10 }
   0x9   :  { %p65_p3 = scmp.ne.s32.totalorder %s19_s10, %s64_s18  ;;  %p70_p5 = scmp.lt.s32.totalorder %s64_s18, %s64_s18 }
   0xb   :  { %p71_p6 = por %p70_p5, %p69_p4 }
   0xd   :  { %p72_p7 = pnand %p71_p6, %p65_p3 }
   0xf   :  { %75 = shalt.err (!%p72_p7)
}
  0x10   :  { %21 = dma.hbm_to_vmem [thread:$0]  %s147_s1, 256, %s19_s10, [#allocation4]  }
  0x11   :  { %98 = dma.done.wait [#allocation4], 256  }
  0x12   :  { %99 = vsyncadd [#allocation4], 4294967040  ;;  %v28_v0 = vstv %s146_s0  ;;  %v26_v1 = vld [vmem:[#allocation3] sm:$0xff]  ;;  %v27_v2 = vld [vmem:[#allocation3 + $0x8] sm:$0xff]  ;;  %s103_s23 = smov [#allocation6]  }
  0x13   :  { %v29_v3 = vmul.f32 %v28_v0, %v26_v1  ;;  %v30_v4 = vmul.f32 %v28_v0, %v27_v2  ;;  %s43_s24 = sshll.u32 %s103_s23, 4  ;;  %s44_s24 = int_to_ptr.vmem [resolvable:$true] %s43_s24 }
  0x14   :  { %s76_s1 = scalar_lea.vmem %s44_s24, 256  ;;  %p81_p9 = scmp.lt.s32.totalorder %s44_s24, %s44_s24 }
  0x15   :  { %v31_v5 = vmax.f32 %v29_v3, 0.0  ;;  %v32_v6 = vmax.f32 %v30_v4, 0.0  ;;  %p77_p8 = scmp.ne.s32.totalorder %s44_s24, %s76_s1  ;;  %p82_p10 = scmp.lt.s32.totalorder %s76_s1, %s76_s1 }
  0x17   :  { %v33_v7 = vmin.f32 %v31_v5, 1.0  ;;  %v34_v8 = vmin.f32 %v32_v6, 1.0  ;;  %p83_p11 = por %p82_p10, %p81_p9 }
  0x19   :  { %35 = vst [vmem:[#allocation6] sm:$0xff] %v33_v7  ;;  %36 = vst [vmem:[#allocation6 + $0x8] sm:$0xff] %v34_v8  ;;  %p84_p12 = pnand %p83_p11, %p77_p8 }
  0x1b   :  { %87 = shalt.err (!%p84_p12)
}
  0x1c   :  { %s88_s26 = scalar_lea.hbm %s148_s2, 256 }
  0x1d   :  { %p89_p13 = scmp.ne.s32.totalorder %s148_s2, %s88_s26  ;;  %p92_p0 = scmp.lt.u32.totalorder %s88_s26, %s148_s2 }
  0x1f   :  { %p94_p1 = pnand %p92_p0, %p89_p13 }
  0x21   :  { %97 = shalt.err (!%p94_p1)
}
  0x22   :  { %46 = dma.vmem_to_hbm [thread:$0]  %s44_s24, 256, %s148_s2, [#allocation5]  }
  0x23   :  { %100 = dma.done.wait [#allocation5], 256  }
  0x24   :  { %101 = vsyncadd [#allocation5], 4294967040 }
  0x25   :  { %50 = vsyncpa [#allocation4], 1 }
  0x26   :  { %51 = vsyncpa [#allocation5], 1 }

</bundles_post_ra>
